<compile_context>
chip_gen: v6e
topology: v6e:2x2x1
jax: 0.10.0
libtpu: 0.0.40
codegen_flags: <defaults>
</compile_context>

<pallas_src>
import jax
import jax.numpy as jnp
from jax.experimental import pallas as pl
from jax.experimental.pallas import tpu as pltpu

EPS = 1e-8


# ----------------------------------------------------------------------------- kernels

def _dain_folded_kernel(x_ref, segmean_ref, segbcast_ref, wm_ref, ws_ref, wg_ref,
                        bg_ref, o_ref):
    """Lane-dense path: x block is (nb, C*T); channel c occupies lanes [c*T, (c+1)*T)."""
    x = x_ref[...].astype(jnp.float32)              # (nb, C*T)   lane-dense tile
    seg_mean = segmean_ref[...]                     # (C*T, C)    column c = 1/T on channel c
    seg_bcast = segbcast_ref[...]                   # (C, C*T)    row c    = 1   on channel c
    wmT, wsT, wgT = wm_ref[...], ws_ref[...], wg_ref[...]
    bg = bg_ref[...]                                # (1, C)

    # --- stage 1: adaptive mean shift (per-channel mean via one MXU segment-reduce) ---
    avg = jnp.dot(x, seg_mean, preferred_element_type=jnp.float32)            # (nb, C)
    a_avg = jnp.dot(avg, wmT, preferred_element_type=jnp.float32)             # (nb, C)
    xc = x - jnp.dot(a_avg, seg_bcast, preferred_element_type=jnp.float32)    # (nb, C*T)

    # --- stage 2: adaptive scale (two-pass variance, matches torch numerics) ---
    msq = jnp.dot(xc * xc, seg_mean, preferred_element_type=jnp.float32)      # (nb, C)
    std = jnp.sqrt(msq + EPS)
    a_std = jnp.dot(std, wsT, preferred_element_type=jnp.float32)
    a_std = jnp.where(a_std <= EPS, jnp.float32(1.0), a_std)
    inv_std = pl.reciprocal(a_std)                  # exact (approx=False), (nb, C) only

    # --- stage 3: gate from the analytic post-scale mean: mean(xs) = (avg - a_avg)*inv_std
    gate = jax.nn.sigmoid(
        jnp.dot((avg - a_avg) * inv_std, wgT, preferred_element_type=jnp.float32) + bg)

    # --- fused apply: out = xc * broadcast(inv_std * gate) --- single lane-dense store ---
    scale_b = jnp.dot(inv_std * gate, seg_bcast, preferred_element_type=jnp.float32)
    o_ref[...] = (xc * scale_b).astype(o_ref.dtype)


def _dain_native_kernel(x_ref, wm_ref, ws_ref, wg_ref, bg_ref, o_ref):
    """Native (nb, C, T) path for T that is already lane-dense (multiple of 128)."""
    x = x_ref[...].astype(jnp.float32)              # (nb, C, T)
    wmT, wsT, wgT = wm_ref[...], ws_ref[...], wg_ref[...]
    bg = bg_ref[...]                                # (1, C)
    inv_T = jnp.float32(1.0 / x.shape[-1])

    avg = jnp.sum(x, axis=-1) * inv_T                                         # (nb, C)
    a_avg = jnp.dot(avg, wmT, preferred_element_type=jnp.float32)             # (nb, C)
    xc = x - a_avg[:, :, None]

    msq = jnp.sum(xc * xc, axis=-1) * inv_T                                   # (nb, C)
    std = jnp.sqrt(msq + EPS)
    a_std = jnp.dot(std, wsT, preferred_element_type=jnp.float32)
    a_std = jnp.where(a_std <= EPS, jnp.float32(1.0), a_std)
    inv_std = pl.reciprocal(a_std)                  # exact

    # analytic third statistic + fused gate*scale: no third reduce, no xs intermediate
    gate = jax.nn.sigmoid(
        jnp.dot((avg - a_avg) * inv_std, wgT, preferred_element_type=jnp.float32) + bg)
    scale = inv_std * gate                                                    # (nb, C)
    o_ref[...] = (xc * scale[:, :, None]).astype(o_ref.dtype)


# ------------------------------------------------------------------------- sizing helpers

def _vmem_capacity_bytes():
    try:
        cap = int(pltpu.get_tpu_info().vmem_capacity_bytes)
        if cap > 0:
            return cap
    except Exception:
        pass
    return 64 * 1024 * 1024   # conservative fallback: v7x per-TensorCore VMEM


def _block_budget_bytes():
    # Peak per step ~= 2x in + 2x out (double-buffered) + ~3x f32 intermediates, so keep
    # the I/O block near capacity/16 -> total ~capacity/2 (v7x: ~4 MiB block, ~28 MiB peak).
    return max(512 * 1024, _vmem_capacity_bytes() // 16)


def _pick_batch_block(N, per_sample_bytes, budget, batch_is_sublane):
    nb_cap = max(1, budget // max(1, per_sample_bytes))
    # >= 4 balanced grid steps (when N allows) so both v7x TensorCores stay fed.
    nb = max(1, min(nb_cap, pl.cdiv(N, 4)))
    if batch_is_sublane and nb < N:
        # The batch dim is the block's second-to-last dim -> keep it a multiple of 8
        # (or the full extent) to respect the (8, 128) tiling constraint.
        nb = (nb // 8) * 8
        if nb == 0:
            nb = N if N <= 8 else 8
    return int(min(nb, N))


def _use_folded_layout(C, T):
    # Fold (C, T) -> C*T when T would waste vreg lanes / force masked stores, as long as
    # the (C*T, C) segment-reduce matrix stays small (<= 2 MiB).
    return (T % 128 != 0) and (C * T * C * 4 <= 2 * 1024 * 1024)


# --------------------------------------------------------------------------------- wrapper

@jax.jit
def dain_forward(x, w_mean, w_scale, w_gate, b_gate):
    """x: (N, C, T) matching the PyTorch layout. Returns (N, C, T)."""
    N, C, T = x.shape
    wmT = w_mean.T            # nn.Linear computes y = x @ W^T
    wsT = w_scale.T
    wgT = w_gate.T
    bg = b_gate.reshape(1, C)

    budget = _block_budget_bytes()
    vmem_limit = _vmem_capacity_bytes() // 2

    if _use_folded_layout(C, T):
        # Lane-dense path: fold (C, T) -> C*T (free, row-major contiguous reshape in HBM).
        ct = C * T
        ch = jnp.arange(ct, dtype=jnp.int32) // T
        seg_bcast = (ch[None, :] == jnp.arange(C, dtype=jnp.int32)[:, None]
                     ).astype(jnp.float32)                      # (C, C*T): 0/1 per channel
        seg_mean = seg_bcast.T / jnp.float32(T)                 # (C*T, C): 1/T per channel

        nb = _pick_batch_block(N, ct * 4, budget, batch_is_sublane=True)
        x2 = x.reshape(N, ct)

        out2 = pl.pallas_call(
            _dain_folded_kernel,
            out_shape=jax.ShapeDtypeStruct((N, ct), x.dtype),
            grid_spec=pltpu.PrefetchScalarGridSpec(
                num_scalar_prefetch=0,
                grid=(pl.cdiv(N, nb),),
                in_specs=[
                    pl.BlockSpec((nb, ct), lambda n: (n, 0)),
                    pl.BlockSpec((ct, C), lambda n: (0, 0)),    # seg_mean (DMA'd once)
                    pl.BlockSpec((C, ct), lambda n: (0, 0)),    # seg_bcast (DMA'd once)
                    pl.BlockSpec((C, C), lambda n: (0, 0)),
                    pl.BlockSpec((C, C), lambda n: (0, 0)),
                    pl.BlockSpec((C, C), lambda n: (0, 0)),
                    pl.BlockSpec((1, C), lambda n: (0, 0)),
                ],
                out_specs=pl.BlockSpec((nb, ct), lambda n: (n, 0)),
            ),
            compiler_params=pltpu.CompilerParams(
                dimension_semantics=("parallel",),
                vmem_limit_bytes=int(vmem_limit),
            ),
        )(x2, seg_mean, seg_bcast, wmT, wsT, wgT, bg)
        return out2.reshape(N, C, T)

    # Native layout path: T already maps densely onto the 128-lane axis.
    nb = _pick_batch_block(N, C * T * 4, budget, batch_is_sublane=False)
    return pl.pallas_call(
        _dain_native_kernel,
        out_shape=jax.ShapeDtypeStruct((N, C, T), x.dtype),
        grid_spec=pltpu.PrefetchScalarGridSpec(
            num_scalar_prefetch=0,
            grid=(pl.cdiv(N, nb),),
            in_specs=[
                pl.BlockSpec((nb, C, T), lambda n: (n, 0, 0)),
                pl.BlockSpec((C, C), lambda n: (0, 0)),
                pl.BlockSpec((C, C), lambda n: (0, 0)),
                pl.BlockSpec((C, C), lambda n: (0, 0)),
                pl.BlockSpec((1, C), lambda n: (0, 0)),
            ],
            out_specs=pl.BlockSpec((nb, C, T), lambda n: (n, 0, 0)),
        ),
        compiler_params=pltpu.CompilerParams(
            dimension_semantics=("parallel",),
            vmem_limit_bytes=int(vmem_limit),
        ),
    )(x, wmT, wsT, wgT, bg)


# ------------------------------------------------------------------------------- reference

def dain_reference(x, w_mean, w_scale, w_gate, b_gate):
    """Pure-JAX mirror of the PyTorch forward (x: (N, C, T)), full-precision matmuls."""
    hp = jax.lax.Precision.HIGHEST
    avg = jnp.mean(x, axis=2)
    a_avg = jnp.matmul(avg, w_mean.T, precision=hp)
    xc = x - a_avg[:, :, None]
    std = jnp.sqrt(jnp.mean(xc * xc, axis=2) + EPS)
    a_std = jnp.matmul(std, w_scale.T, precision=hp)
    a_std = jnp.where(a_std <= EPS, 1.0, a_std)
    xs = xc / a_std[:, :, None]
    avg2 = jnp.mean(xs, axis=2)
    gate = jax.nn.sigmoid(jnp.matmul(avg2, w_gate.T, precision=hp) + b_gate)
    return xs * gate[:, :, None]


# ------------------------------------------------------------------------------------ main

if __name__ == "__main__":
    key = jax.random.PRNGKey(0)
    kx, kw, kb = jax.random.split(key, 3)

    # Primary case: small seq_len (T=16) -> exercises the folded, lane-dense path.
    N, C, T = 32, 32, 16   # batch, input_dim, seq_len
    x = jax.random.normal(kx, (N, C, T), dtype=jnp.float32) * 2.0 + 0.5
    w_mean = jnp.eye(C, dtype=jnp.float32)        # module init: identity, no bias
    w_scale = jnp.eye(C, dtype=jnp.float32)       # module init: identity, no bias
    bound = float(C) ** -0.5
    w_gate = jax.random.uniform(kw, (C, C), jnp.float32, -bound, bound)
    b_gate = jax.random.uniform(kb, (C,), jnp.float32, -bound, bound)

    out = jax.block_until_ready(dain_forward(x, w_mean, w_scale, w_gate, b_gate))
    ref = dain_reference(x, w_mean, w_scale, w_gate, b_gate)
    assert out.shape == (N, C, T)
    assert jnp.allclose(out, ref, atol=1e-4, rtol=1e-4), "folded-path mismatch vs reference"

    # Secondary case: lane-dense T (multiple of 128) -> exercises the native-layout path.
    N2, C2, T2 = 8, 16, 128
    x2 = jax.random.normal(kx, (N2, C2, T2), dtype=jnp.float32)
    w_m2 = jnp.eye(C2, dtype=jnp.float32)
    w_s2 = jnp.eye(C2, dtype=jnp.float32)
    b2 = float(C2) ** -0.5
    w_g2 = jax.random.uniform(kw, (C2, C2), jnp.float32, -b2, b2)
    b_g2 = jax.random.uniform(kb, (C2,), jnp.float32, -b2, b2)

    out2 = jax.block_until_ready(dain_forward(x2, w_m2, w_s2, w_g2, b_g2))
    ref2 = dain_reference(x2, w_m2, w_s2, w_g2, b_g2)
    assert jnp.allclose(out2, ref2, atol=1e-4, rtol=1e-4), "native-path mismatch vs reference"

    print("KERNEL_OK")
</pallas_src>

<mosaic_0001>
module attributes {stable_mosaic.version = 11 : i64} {
  func.func @_dain_folded_kernel(%arg0: i32, %arg1: memref<8x512xf32, #tpu.memory_space<vmem>>, %arg2: memref<512x32xf32, #tpu.memory_space<vmem>>, %arg3: memref<32x512xf32, #tpu.memory_space<vmem>>, %arg4: memref<32x32xf32, #tpu.memory_space<vmem>>, %arg5: memref<32x32xf32, #tpu.memory_space<vmem>>, %arg6: memref<32x32xf32, #tpu.memory_space<vmem>>, %arg7: memref<1x32xf32, #tpu.memory_space<vmem>>, %arg8: memref<8x512xf32, #tpu.memory_space<vmem>>) attributes {dimension_semantics = [#tpu.dimension_semantics<parallel>], iteration_bounds = array<i64: 4>, scalar_prefetch = 0 : i64, scratch_operands = 0 : i64, tpu.core_type = #tpu.core_type<tc>, window_params = [{transform_indices = @transform_0, window_bounds = array<i64: 8, 512>}, {pipeline_mode = #tpu.pipeline_mode<synchronous>, transform_indices = @transform_1, window_bounds = array<i64: 512, 32>}, {pipeline_mode = #tpu.pipeline_mode<synchronous>, transform_indices = @transform_2, window_bounds = array<i64: 32, 512>}, {pipeline_mode = #tpu.pipeline_mode<synchronous>, transform_indices = @transform_3, window_bounds = array<i64: 32, 32>}, {pipeline_mode = #tpu.pipeline_mode<synchronous>, transform_indices = @transform_4, window_bounds = array<i64: 32, 32>}, {pipeline_mode = #tpu.pipeline_mode<synchronous>, transform_indices = @transform_5, window_bounds = array<i64: 32, 32>}, {pipeline_mode = #tpu.pipeline_mode<synchronous>, transform_indices = @transform_6, window_bounds = array<i64: 1, 32>}, {transform_indices = @transform_7, window_bounds = array<i64: 8, 512>}]} {
    %c0 = arith.constant 0 : index
    %c0_0 = arith.constant 0 : index
    %0 = vector.load %arg1[%c0, %c0_0] : memref<8x512xf32, #tpu.memory_space<vmem>>, vector<8x512xf32>
    %c0_1 = arith.constant 0 : index
    %c0_2 = arith.constant 0 : index
    %1 = vector.load %arg2[%c0_1, %c0_2] : memref<512x32xf32, #tpu.memory_space<vmem>>, vector<512x32xf32>
    %c0_3 = arith.constant 0 : index
    %c0_4 = arith.constant 0 : index
    %2 = vector.load %arg3[%c0_3, %c0_4] : memref<32x512xf32, #tpu.memory_space<vmem>>, vector<32x512xf32>
    %c0_5 = arith.constant 0 : index
    %c0_6 = arith.constant 0 : index
    %3 = vector.load %arg4[%c0_5, %c0_6] : memref<32x32xf32, #tpu.memory_space<vmem>>, vector<32x32xf32>
    %c0_7 = arith.constant 0 : index
    %c0_8 = arith.constant 0 : index
    %4 = vector.load %arg5[%c0_7, %c0_8] : memref<32x32xf32, #tpu.memory_space<vmem>>, vector<32x32xf32>
    %c0_9 = arith.constant 0 : index
    %c0_10 = arith.constant 0 : index
    %5 = vector.load %arg6[%c0_9, %c0_10] : memref<32x32xf32, #tpu.memory_space<vmem>>, vector<32x32xf32>
    %c0_11 = arith.constant 0 : index
    %c0_12 = arith.constant 0 : index
    %6 = vector.load %arg7[%c0_11, %c0_12] : memref<1x32xf32, #tpu.memory_space<vmem>>, vector<1x32xf32>
    %cst = arith.constant dense<0.000000e+00> : vector<8x32xf32>
    %7 = tpu.matmul %0, %1, %cst {dimension_numbers = #tpu.dot_dimension_numbers<[1], [0], [0], [1], [0, 0, 1, 1], [], []>} : vector<8x512xf32>, vector<512x32xf32>, vector<8x32xf32> -> vector<8x32xf32>
    %cst_13 = arith.constant dense<0.000000e+00> : vector<8x32xf32>
    %8 = tpu.matmul %7, %3, %cst_13 {dimension_numbers = #tpu.dot_dimension_numbers<[1], [0], [0], [1], [0, 0, 1, 1], [], []>} : vector<8x32xf32>, vector<32x32xf32>, vector<8x32xf32> -> vector<8x32xf32>
    %cst_14 = arith.constant dense<0.000000e+00> : vector<8x512xf32>
    %9 = tpu.matmul %8, %2, %cst_14 {dimension_numbers = #tpu.dot_dimension_numbers<[1], [0], [0], [1], [0, 0, 1, 1], [], []>} : vector<8x32xf32>, vector<32x512xf32>, vector<8x512xf32> -> vector<8x512xf32>
    %10 = arith.subf %0, %9 : vector<8x512xf32>
    %11 = arith.mulf %10, %10 : vector<8x512xf32>
    %cst_15 = arith.constant dense<0.000000e+00> : vector<8x32xf32>
    %12 = tpu.matmul %11, %1, %cst_15 {dimension_numbers = #tpu.dot_dimension_numbers<[1], [0], [0], [1], [0, 0, 1, 1], [], []>} : vector<8x512xf32>, vector<512x32xf32>, vector<8x32xf32> -> vector<8x32xf32>
    %cst_16 = arith.constant 9.99999993E-9 : f32
    %13 = vector.broadcast %cst_16 : f32 to vector<8x32xf32>
    %14 = arith.addf %12, %13 : vector<8x32xf32>
    %15 = math.sqrt %14 : vector<8x32xf32>
    %cst_17 = arith.constant dense<0.000000e+00> : vector<8x32xf32>
    %16 = tpu.matmul %15, %4, %cst_17 {dimension_numbers = #tpu.dot_dimension_numbers<[1], [0], [0], [1], [0, 0, 1, 1], [], []>} : vector<8x32xf32>, vector<32x32xf32>, vector<8x32xf32> -> vector<8x32xf32>
    %cst_18 = arith.constant 9.99999993E-9 : f32
    %17 = vector.broadcast %cst_18 : f32 to vector<8x32xf32>
    %18 = arith.cmpf ole, %16, %17 : vector<8x32xf32>
    %cst_19 = arith.constant 1.000000e+00 : f32
    %19 = vector.broadcast %cst_19 : f32 to vector<8x32xf32>
    %20 = arith.select %18, %19, %16 : vector<8x32xi1>, vector<8x32xf32>
    %21 = tpu.reciprocal %20 : vector<8x32xf32> -> vector<8x32xf32>
    %22 = arith.subf %7, %8 : vector<8x32xf32>
    %23 = arith.mulf %22, %21 : vector<8x32xf32>
    %cst_20 = arith.constant dense<0.000000e+00> : vector<8x32xf32>
    %24 = tpu.matmul %23, %5, %cst_20 {dimension_numbers = #tpu.dot_dimension_numbers<[1], [0], [0], [1], [0, 0, 1, 1], [], []>} : vector<8x32xf32>, vector<32x32xf32>, vector<8x32xf32> -> vector<8x32xf32>
    %25 = vector.broadcast %6 : vector<1x32xf32> to vector<8x32xf32>
    %26 = arith.addf %24, %25 : vector<8x32xf32>
    %27 = arith.negf %26 : vector<8x32xf32>
    %28 = math.exp %27 : vector<8x32xf32>
    %cst_21 = arith.constant 1.000000e+00 : f32
    %29 = vector.broadcast %cst_21 : f32 to vector<8x32xf32>
    %30 = arith.addf %29, %28 : vector<8x32xf32>
    %31 = arith.divf %29, %30 : vector<8x32xf32>
    %32 = arith.mulf %21, %31 : vector<8x32xf32>
    %cst_22 = arith.constant dense<0.000000e+00> : vector<8x512xf32>
    %33 = tpu.matmul %32, %2, %cst_22 {dimension_numbers = #tpu.dot_dimension_numbers<[1], [0], [0], [1], [0, 0, 1, 1], [], []>} : vector<8x32xf32>, vector<32x512xf32>, vector<8x512xf32> -> vector<8x512xf32>
    %34 = arith.mulf %10, %33 : vector<8x512xf32>
    %c0_23 = arith.constant 0 : index
    %c0_24 = arith.constant 0 : index
    %35 = vector.load %arg8[%c0_23, %c0_24] : memref<8x512xf32, #tpu.memory_space<vmem>>, vector<8x512xf32>
    tpu.vector_store %arg8[%c0_23, %c0_24], %34 {strides = array<i32>} : memref<8x512xf32, #tpu.memory_space<vmem>>, vector<8x512xf32>,
    return
  }
  func.func @transform_0(%arg0: i32) -> (i32, i32) {
    %c0_i32 = arith.constant 0 : i32
    %c0_i32_0 = arith.constant 0 : i32
    return %arg0, %c0_i32 : i32, i32
  }
  func.func @transform_1(%arg0: i32) -> (i32, i32) {
    %c0_i32 = arith.constant 0 : i32
    %c0_i32_0 = arith.constant 0 : i32
    %c0_i32_1 = arith.constant 0 : i32
    return %c0_i32, %c0_i32_0 : i32, i32
  }
  func.func @transform_2(%arg0: i32) -> (i32, i32) {
    %c0_i32 = arith.constant 0 : i32
    %c0_i32_0 = arith.constant 0 : i32
    %c0_i32_1 = arith.constant 0 : i32
    return %c0_i32, %c0_i32_0 : i32, i32
  }
  func.func @transform_3(%arg0: i32) -> (i32, i32) {
    %c0_i32 = arith.constant 0 : i32
    %c0_i32_0 = arith.constant 0 : i32
    %c0_i32_1 = arith.constant 0 : i32
    return %c0_i32, %c0_i32_0 : i32, i32
  }
  func.func @transform_4(%arg0: i32) -> (i32, i32) {
    %c0_i32 = arith.constant 0 : i32
    %c0_i32_0 = arith.constant 0 : i32
    %c0_i32_1 = arith.constant 0 : i32
    return %c0_i32, %c0_i32_0 : i32, i32
  }
  func.func @transform_5(%arg0: i32) -> (i32, i32) {
    %c0_i32 = arith.constant 0 : i32
    %c0_i32_0 = arith.constant 0 : i32
    %c0_i32_1 = arith.constant 0 : i32
    return %c0_i32, %c0_i32_0 : i32, i32
  }
  func.func @transform_6(%arg0: i32) -> (i32, i32) {
    %c0_i32 = arith.constant 0 : i32
    %c0_i32_0 = arith.constant 0 : i32
    %c0_i32_1 = arith.constant 0 : i32
    return %c0_i32, %c0_i32_0 : i32, i32
  }
  func.func @transform_7(%arg0: i32) -> (i32, i32) {
    %c0_i32 = arith.constant 0 : i32
    %c0_i32_0 = arith.constant 0 : i32
    return %arg0, %c0_i32 : i32, i32
  }
}

</mosaic_0001>

<bundles_post_ra>
// kernel: dain_forward.1
= control target key start
LH: loop header
LB: loop body
LE: loop exit
PB: predicated region body
PF: predicated region fallthrough
CT: control target
= control target key end

     0   :  { %s1540_s24 = smov 0   ;;  %s2247_s0 = inlined_call_operand.vmem [shape: f32[32,512], index: 0, kind: input, shape index: {}]   ;;  %s2248_s1 = inlined_call_operand.vmem [shape: f32[512,32], index: 1, kind: input, shape index: {}]   ;;  %s2249_s2 = inlined_call_operand.vmem [shape: f32[32,512], index: 2, kind: input, shape index: {}]   ;;  %s2250_s3 = inlined_call_operand.vmem [shape: f32[32,32], index: 3, kind: input, shape index: {}]   ;;  %s2251_s4 = inlined_call_operand.vmem [shape: f32[32,32], index: 4, kind: input, shape index: {}]   ;;  %s2252_s5 = inlined_call_operand.vmem [shape: f32[32,32], index: 5, kind: input, shape index: {}]   ;;  %s2253_s6 = inlined_call_operand.vmem [shape: f32[1,32], index: 6, kind: input, shape index: {}]   ;;  %s2254_s7 = inlined_call_operand.vmem [shape: f32[32,512], index: 7, kind: output, shape index: {}]  }
   0x1 LB: > { %s1262_s25 = sadd.s32 4294967295, %s1496_s24   ;;  %p1266_p0 = scmp.ge.s32.totalorder %s1496_s24, 1  ;;  %s1496_s24 = sphi %s1540_s24, %s17_s24  }
   0x2   : > { %p237_p1 = scmp.lt.s32.totalorder %s1496_s24, 5 }
   0x4   : > { %p238_p2 = pnand %p1266_p0, %p237_p1 }
   0x6   : > { %241 = sbr.rel (%p238_p2) target bundleno = 1496 (0x5d8), region = 48 }
   0xb   : > { %v1551_v0 = vld [vmem:[%s2248_s1 + $0xf8] sm:$0xff]  ;;  %v1573_v4 = vld [vmem:[%s2248_s1 + $0xf0] sm:$0xff]  ;;  %v1595_v8 = vld [vmem:[%s2248_s1 + $0xe8] sm:$0xff]  ;;  %p1760_p3 = scmp.lt.s32.totalorder %s1262_s25, 3  ;;  %vm1499_vm0 = vmmov 0   ;;  %vm516_vm1 = vcmask 261120  }
   0xc   : > { %v1556_v1 = vld [vmem:[%s2248_s1 + $0x1f8] sm:$0xff]  ;;  %1284 = vmatprep.subr.mxu0 %v1551_v0  ;;  %v1578_v5 = vld [vmem:[%s2248_s1 + $0x1f0] sm:$0xff]  ;;  %v1602_v9 = vld [vmem:[%s2248_s1 + $0x1e8] sm:$0xff] }
   0xd   : > { %v1561_v2 = vld [vmem:[%s2248_s1 + $0x78] sm:$0xff]  ;;  %1319 = vmatprep.subr.mxu1 %v1556_v1  ;;  %v1585_v6 = vld [vmem:[%s2248_s1 + $0x70] sm:$0xff]  ;;  %v1607_v10 = vld [vmem:[%s2248_s1 + $0x68] sm:$0xff]  ;;  %s2332_s25 = smov (!%p1760_p3, %s1262_s25), 3 }
   0xe   : > { %v1568_v3 = vld [vmem:[%s2248_s1 + $0x178] sm:$0xff]  ;;  %1285 = vmatpush3.msra.mxu0 %v1561_v2  ;;  %v1590_v7 = vld [vmem:[%s2248_s1 + $0x170] sm:$0xff]  ;;  %v1612_v11 = vld [vmem:[%s2248_s1 + $0x168] sm:$0xff]  ;;  %s1282_s26 = sshll.u32 %s2332_s25, 5 }
   0xf   : > { %1320 = vmatpush3.msra.mxu1 %v1568_v3  ;;  %1286 = vmatprep.subr.mxu0 %v1573_v4  ;;  %v1619_v12 = vld [vmem:[%s2248_s1 + $0xe0] sm:$0xff]  ;;  %v1643_v16 = vld [vmem:[%s2248_s1 + $0xd8] sm:$0xff]  ;;  %v1667_v20 = vld [vmem:[%s2248_s1 + $0xd0] sm:$0xff]  ;;  %s273_s18 = scalar_lea.vmem %s2247_s0, %s1282_s26  ;;  %s278_s11 = scalar_lea.vmem %s2254_s7, %s1282_s26 }
  0x10   : > { %1321 = vmatprep.subr.mxu1 %v1578_v5  ;;  %1287 = vmatpush3.msra.mxu0 %v1585_v6  ;;  %v1624_v13 = vld [vmem:[%s2248_s1 + $0x1e0] sm:$0xff]  ;;  %v1648_v17 = vld [vmem:[%s2248_s1 + $0x1d8] sm:$0xff]  ;;  %v1672_v21 = vld [vmem:[%s2248_s1 + $0x1d0] sm:$0xff] }
  0x11   : > { %1322 = vmatpush3.msra.mxu1 %v1590_v7  ;;  %1288 = vmatprep.subr.mxu0 %v1595_v8  ;;  %v1631_v14 = vld [vmem:[%s2248_s1 + $0x60] sm:$0xff]  ;;  %v1655_v18 = vld [vmem:[%s2248_s1 + $0x58] sm:$0xff]  ;;  %v1679_v22 = vld [vmem:[%s2248_s1 + $0x50] sm:$0xff] }
  0x12   : > { %1323 = vmatprep.subr.mxu1 %v1602_v9  ;;  %v1636_v15 = vld [vmem:[%s2248_s1 + $0x160] sm:$0xff]  ;;  %1289 = vmatpush3.msra.mxu0 %v1607_v10  ;;  %v1660_v19 = vld [vmem:[%s2248_s1 + $0x158] sm:$0xff]  ;;  %v1684_v23 = vld [vmem:[%s2248_s1 + $0x150] sm:$0xff] }
  0x13   : > { %1324 = vmatpush3.msra.mxu1 %v1612_v11  ;;  %1290 = vmatprep.subr.mxu0 %v1619_v12  ;;  %v1691_v24 = vld [vmem:[%s2248_s1 + $0xc8] sm:$0xff]  ;;  %v1715_v28 = vld [vmem:[%s2248_s1 + $0xc0] sm:$0xff]  ;;  %v1739_v32 = vld [vmem:[%s2248_s1 + $0xb8] sm:$0xff] }
  0x14   : > { %1325 = vmatprep.subr.mxu1 %v1624_v13  ;;  %1291 = vmatpush3.msra.mxu0 %v1631_v14  ;;  %v1696_v25 = vld [vmem:[%s2248_s1 + $0x1c8] sm:$0xff]  ;;  %v1720_v29 = vld [vmem:[%s2248_s1 + $0x1c0] sm:$0xff]  ;;  %v1744_v33 = vld [vmem:[%s2248_s1 + $0x1b8] sm:$0xff] }
  0x15   : > { %1326 = vmatpush3.msra.mxu1 %v1636_v15  ;;  %1292 = vmatprep.subr.mxu0 %v1643_v16  ;;  %v1703_v26 = vld [vmem:[%s2248_s1 + $0x48] sm:$0xff]  ;;  %v1727_v30 = vld [vmem:[%s2248_s1 + $0x40] sm:$0xff]  ;;  %v1751_v34 = vld [vmem:[%s2248_s1 + $0x38] sm:$0xff] }
  0x16   : > { %1327 = vmatprep.subr.mxu1 %v1648_v17  ;;  %1293 = vmatpush3.msra.mxu0 %v1655_v18  ;;  %v1708_v27 = vld [vmem:[%s2248_s1 + $0x148] sm:$0xff]  ;;  %v1732_v31 = vld [vmem:[%s2248_s1 + $0x140] sm:$0xff]  ;;  %v1756_v35 = vld [vmem:[%s2248_s1 + $0x138] sm:$0xff] }
  0x17   : > { %1328 = vmatpush3.msra.mxu1 %v1660_v19  ;;  %1294 = vmatprep.subr.mxu0 %v1667_v20  ;;  %v1769_v36 = vld [vmem:[%s2248_s1 + $0xb0] sm:$0xff]  ;;  %v1793_v40 = vld [vmem:[%s2248_s1 + $0xa8] sm:$0xff]  ;;  %v1823_v44 = vld [vmem:[%s2248_s1 + $0xa0] sm:$0xff] }
  0x18   : > { %1329 = vmatprep.subr.mxu1 %v1672_v21  ;;  %1295 = vmatpush3.msra.mxu0 %v1679_v22  ;;  %v1774_v37 = vld [vmem:[%s2248_s1 + $0x1b0] sm:$0xff]  ;;  %v1798_v41 = vld [vmem:[%s2248_s1 + $0x1a8] sm:$0xff]  ;;  %v1828_v45 = vld [vmem:[%s2248_s1 + $0x1a0] sm:$0xff] }
  0x19   : > { %1330 = vmatpush3.msra.mxu1 %v1684_v23  ;;  %1296 = vmatprep.subr.mxu0 %v1691_v24  ;;  %v1781_v38 = vld [vmem:[%s2248_s1 + $0x30] sm:$0xff]  ;;  %v1805_v42 = vld [vmem:[%s2248_s1 + $0x28] sm:$0xff]  ;;  %v1835_v46 = vld [vmem:[%s2248_s1 + $0x20] sm:$0xff] }
  0x1a   : > { %1331 = vmatprep.subr.mxu1 %v1696_v25  ;;  %1297 = vmatpush3.msra.mxu0 %v1703_v26  ;;  %v1786_v39 = vld [vmem:[%s2248_s1 + $0x130] sm:$0xff]  ;;  %v1810_v43 = vld [vmem:[%s2248_s1 + $0x128] sm:$0xff]  ;;  %v1840_v47 = vld [vmem:[%s2248_s1 + $0x120] sm:$0xff] }
  0x1b   : > { %1332 = vmatpush3.msra.mxu1 %v1708_v27  ;;  %1298 = vmatprep.subr.mxu0 %v1715_v28  ;;  %v1847_v48 = vld [vmem:[%s2248_s1 + $0x98] sm:$0xff]  ;;  %v1872_v52 = vld [vmem:[%s2248_s1 + $0x90] sm:$0xff]  ;;  %v1896_v56 = vld [vmem:[%s2248_s1 + $0x88] sm:$0xff] }
  0x1c   : > { %1333 = vmatprep.subr.mxu1 %v1720_v29  ;;  %1299 = vmatpush3.msra.mxu0 %v1727_v30  ;;  %v1852_v49 = vld [vmem:[%s2248_s1 + $0x198] sm:$0xff]  ;;  %v1877_v53 = vld [vmem:[%s2248_s1 + $0x190] sm:$0xff]  ;;  %2284 = vst [vmem:[#allocation4_spill] sm:$0xff] %v1896_v56  ;;  %v1901_v57 = vld [vmem:[%s2248_s1 + $0x188] sm:$0xff] }
  0x1d   : > { %1334 = vmatpush3.msra.mxu1 %v1732_v31  ;;  %1300 = vmatprep.subr.mxu0 %v1739_v32  ;;  %v1859_v50 = vld [vmem:[%s2248_s1 + $0x18] sm:$0xff]  ;;  %v1884_v54 = vld [vmem:[%s2248_s1 + $0x10] sm:$0xff]  ;;  %2285 = vst [vmem:[#allocation5_spill] sm:$0xff] %v1901_v57  ;;  %v1913_v58 = vld [vmem:[%s2248_s1 + $0x8] sm:$0xff] }
  0x1e   : > { %1335 = vmatprep.subr.mxu1 %v1744_v33  ;;  %1301 = vmatpush3.msra.mxu0 %v1751_v34  ;;  %v1864_v51 = vld [vmem:[%s2248_s1 + $0x118] sm:$0xff]  ;;  %2282 = vst [vmem:[#allocation2_spill] sm:$0xff] %v1884_v54  ;;  %v1889_v55 = vld [vmem:[%s2248_s1 + $0x110] sm:$0xff]  ;;  %2286 = vst [vmem:[#allocation6_spill] sm:$0xff] %v1913_v58 }
  0x1f   : > { %1336 = vmatpush3.msra.mxu1 %v1756_v35  ;;  %1302 = vmatprep.subr.mxu0 %v1769_v36  ;;  %2283 = vst [vmem:[#allocation3_spill] sm:$0xff] %v1889_v55  ;;  %v1918_v59 = vld [vmem:[%s2248_s1 + $0x108] sm:$0xff]  ;;  %v1925_v60 = vld [vmem:[%s2248_s1 + $0x80] sm:$0xff] }
  0x20   : > { %1337 = vmatprep.subr.mxu1 %v1774_v37  ;;  %1303 = vmatpush3.msra.mxu0 %v1781_v38  ;;  %2287 = vst [vmem:[#allocation7_spill] sm:$0xff] %v1918_v59  ;;  %2288 = vst [vmem:[#allocation8_spill] sm:$0xff] %v1925_v60  ;;  %v1930_v61 = vld [vmem:[%s2248_s1 + $0x180] sm:$0xff]  ;;  %v1939_v63 = vld [vmem:[%s273_s18 + $0x8] sm:$0xff] }
  0x21   : > { %1338 = vmatpush3.msra.mxu1 %v1786_v39  ;;  %1304 = vmatprep.subr.mxu0 %v1793_v40  ;;  %2289 = vst [vmem:[#allocation9_spill] sm:$0xff] %v1930_v61  ;;  %v1937_v62 = vld [vmem:[%s2248_s1] sm:$0xff]  ;;  %2291 = vst [vmem:[#allocation11_spill] sm:$0xff] %v1939_v63 }
  0x22   : > { %1339 = vmatprep.subr.mxu1 %v1798_v41  ;;  %1305 = vmatpush3.msra.mxu0 %v1805_v42  ;;  %2290 = vst [vmem:[#allocation10_spill] sm:$0xff] %v1937_v62 }
  0x23   : > { %1340 = vmatpush3.msra.mxu1 %v1810_v43  ;;  %1306 = vmatprep.subr.mxu0 %v1823_v44 }
  0x24   : > { %1341 = vmatprep.subr.mxu1 %v1828_v45  ;;  %1307 = vmatpush3.msra.mxu0 %v1835_v46 }
  0x25   : > { %1342 = vmatpush3.msra.mxu1 %v1840_v47  ;;  %1308 = vmatprep.subr.mxu0 %v1847_v48 }
  0x26   : > { %1343 = vmatprep.subr.mxu1 %v1852_v49  ;;  %1309 = vmatpush3.msra.mxu0 %v1859_v50 }
  0x27   : > { %1344 = vmatpush3.msra.mxu1 %v1864_v51  ;;  %1310 = vmatprep.subr.mxu0 %v1872_v52 }
  0x28   : > { %1345 = vmatprep.subr.mxu1 %v1877_v53  ;;  %1311 = vmatpush3.msra.mxu0 %v1884_v54  ;;  %v1948_v54 = vld [vmem:[%s273_s18 + $0x18] sm:$0xff] }
  0x29   : > { %1346 = vmatpush3.msra.mxu1 %v1889_v55  ;;  %1312 = vmatprep.subr.mxu0 %v1896_v56  ;;  %v1946_v55 = vld [vmem:[%s2248_s1 + $0x100] sm:$0xff]  ;;  %2293 = vst [vmem:[#allocation13_spill] sm:$0xff] %v1948_v54  ;;  %v1954_v56 = vld [vmem:[%s273_s18 + $0x10] sm:$0xff] }
  0x2a   : > { %1347 = vmatprep.subr.mxu1 %v1901_v57  ;;  %1313 = vmatpush3.msra.mxu0 %v1913_v58  ;;  %2292 = vst [vmem:[#allocation12_spill] sm:$0xff] %v1946_v55  ;;  %v1952_v57 = vld [vmem:[%s273_s18] sm:$0xff]  ;;  %2295 = vst [vmem:[#allocation15_spill] sm:$0xff] %v1954_v56 }
  0x2b   : > { %1348 = vmatpush3.msra.mxu1 %v1918_v59  ;;  %1314 = vmatprep.subr.mxu0 %v1925_v60  ;;  %2294 = vst [vmem:[#allocation14_spill] sm:$0xff] %v1952_v57  ;;  %v2264_v59 = vmov 0.0  }
  0x2c   : > { %1349 = vmatprep.subr.mxu1 %v1930_v61  ;;  %1315 = vmatpush3.msra.mxu0 %v1937_v62  ;;  %v366_v61 = vld [vmem:[%s2250_s3 + $0x18] sm:$0xff] }
  0x2d   : > { %440 = vmatprep.mubr.f32.mxu0 %v1939_v63  ;;  %1350 = vmatpush3.msra.mxu1 %v1946_v55  ;;  %v364_v63 = vld [vmem:[%s2250_s3 + $0x8] sm:$0xff] }
  0x2e   : > { %510 = vmatprep.mubr.f32.mxu1 %v1948_v54  ;;  %441 = vmatmul.mubr.f32.vlgmr.msra.gmra.mxu0 %v1952_v57  ;;  %v365_v54 = vld [vmem:[%s2250_s3 + $0x10] sm:$0xff] }
  0x2f   : > { %511 = vmatmul.mubr.f32.vlgmr.msra.gmra.mxu1 %v1954_v56  ;;  %1439 = vmatprep.subr.mxu0 %v2264_v59  ;;  %v1994_v56 = vld [vmem:[%s2249_s2 + $0x60] sm:$0xff] }
  0x30   : > { %657 = vmatprep.mubr.f32.mxu1 %v2264_v59  ;;  %1440 = vmatpush3.msra.mxu0 %v366_v61  ;;  %v363_v61 = vld [vmem:[%s2250_s3] sm:$0xff]  ;;  %2298 = vst [vmem:[#allocation18_spill] sm:$0xff] %v1994_v56 }
  0x31   : > { %1441 = vmatprep.subr.mxu0 %v2264_v59  ;;  %1447 = vmatprep.mubr.msk.f32.mxu0 %vm1499_vm0, %v2264_v59 }
  0x32   : > { %1442 = vmatpush3.msra.mxu0 %v365_v54  ;;  %v1984_v54 = vld [vmem:[%s2249_s2 + $0x68] sm:$0xff] }
  0x33   : > { %1443 = vmatprep.subr.mxu0 %v2264_v59  ;;  %2296 = vst [vmem:[#allocation16_spill] sm:$0xff] %v1984_v54  ;;  %617 = vmatprep.subr.mxu1 %v1984_v54  ;;  %v2013_v54 = vld [vmem:[%s2249_s2 + $0x28] sm:$0xff] }
  0x34   : > { %1444 = vmatpush3.msra.mxu0 %v364_v63  ;;  %v1989_v63 = vld [vmem:[%s2249_s2 + $0x78] sm:$0xff]  ;;  %618 = vmatpush1.msra.mxu1 %v1994_v56  ;;  %2301 = vst [vmem:[#allocation21_spill] sm:$0xff] %v2013_v54  ;;  %v2025_v56 = vld [vmem:[%s2249_s2 + $0x8] sm:$0xff] }
  0x35   : > { %1445 = vmatprep.subr.mxu0 %v2264_v59  ;;  %2297 = vst [vmem:[#allocation17_spill] sm:$0xff] %v1989_v63  ;;  %v2007_v59 = vld [vmem:[%s2249_s2 + $0x40] sm:$0xff] }
  0x36   : > { %1446 = vmatpush3.msra.mxu0 %v363_v61  ;;  %v2001_v61 = vld [vmem:[%s2249_s2 + $0x48] sm:$0xff]  ;;  %2300 = vst [vmem:[#allocation20_spill] sm:$0xff] %v2007_v59 }
  0x37   : > { %688 = vmatprep.subr.mxu0 %v1989_v63  ;;  %2299 = vst [vmem:[#allocation19_spill] sm:$0xff] %v2001_v61  ;;  %619 = vmatprep.subr.mxu1 %v2001_v61  ;;  %v2019_v63 = vld [vmem:[%s2249_s2 + $0x20] sm:$0xff] }
  0x38   : > { %620 = vmatpush1.msra.mxu1 %v2007_v59  ;;  %2302 = vst [vmem:[#allocation22_spill] sm:$0xff] %v2019_v63 }
  0x39   : > { %621 = vmatprep.subr.mxu1 %v2013_v54  ;;  %v2034_v54 = vld [vmem:[%s2249_s2 + $0x70] sm:$0xff] }
  0x3a   : > { %622 = vmatpush1.msra.mxu1 %v2019_v63  ;;  %v2039_v63 = vld [vmem:[%s2249_s2 + $0x58] sm:$0xff] }
  0x3b   : > { %623 = vmatprep.subr.mxu1 %v2025_v56 }
  0xee   : > { %v1316_v61 = vpop.f32.mrf.mxu0 }
  0xef   : > { %v1351_v57 = vpop.f32.mrf.mxu1 }
  0xf0   : > { %v1317_v55 = vpop.f32.mrf.mxu0 }
  0xf1   : > { %v1352_v59 = vpop.f32.mrf.mxu1  ;;  %v1318_v62 = vadd.f32 %v1317_v55, %v1316_v61  ;;  %v2046_v55 = vld [vmem:[%s2249_s2 + $0x50] sm:$0xff]  ;;  %v2073_v61 = vld [vmem:[%s2249_s2] sm:$0xff] }
  0xf2   : > { %v1353_v60 = vadd.f32 %v1352_v59, %v1351_v57  ;;  %2303 = vst [vmem:[#allocation23_spill] sm:$0xff] %v2046_v55  ;;  %v2052_v57 = vld [vmem:[%s2249_s2 + $0x38] sm:$0xff]  ;;  %v2304_v59 = vmov 0.0   ;;  %624 = vmatpush1.msra.mxu1 %v2073_v61 }
  0xf3   : > { %1359 = vmatprep.subr.mxu1 %v1551_v0  ;;  %v2307_v0 = vld [vmem:[#allocation2_spill] sm:$0xff] }
  0xf4   : > { %v2029_v58 = vadd.f32 %v1353_v60, %v1318_v62  ;;  %v2059_v60 = vld [vmem:[%s2249_s2 + $0x30] sm:$0xff]  ;;  %v2065_v62 = vld [vmem:[%s2249_s2 + $0x18] sm:$0xff] }
  0xf5   : > { %2305 = vst [vmem:[#allocation24_spill] sm:$0xff] %v2059_v60  ;;  %2306 = vst [vmem:[#allocation25_spill] sm:$0xff] %v2065_v62 }
  0xf6   : > { %1448 = vmatmul.mubr.msk.f32.vlgmr.msra.gmra.mxu0 %vm516_vm1, %v2029_v58 }
  0xf7   : > { %689 = vmatpush1.msra.mxu0 %v2034_v54  ;;  %728 = vmatprep.mubr.f32.mxu0 %v2304_v59 }
  0xf8   : > { %690 = vmatprep.subr.mxu0 %v2039_v63 }
  0xf9   : > { %691 = vmatpush1.msra.mxu0 %v2046_v55  ;;  %v2078_v55 = vld [vmem:[%s2249_s2 + $0x10] sm:$0xff] }
  0xfa   : > { %692 = vmatprep.subr.mxu0 %v2052_v57 }
  0xfb   : > { %693 = vmatpush1.msra.mxu0 %v2059_v60 }
  0xfc   : > { %694 = vmatprep.subr.mxu0 %v2065_v62 }
  0xfd   : > { %695 = vmatpush1.msra.mxu0 %v2078_v55 }
  0xfe   : > { %1394 = vmatprep.subr.mxu0 %v1556_v1  ;;  %v2308_v1 = vld [vmem:[#allocation3_spill] sm:$0xff] }
 0x1b6   : > { %v2084_v60 = vpop.f32.mrf.mxu0 }
 0x1b7   : > { %1272 = vmatmul.mubr.msk.f32.vlgmr.msra.gmra.mxu1 %vm516_vm1, %v2084_v60  ;;  %1273 = vmatmul.mubr.msk.f32.vlgmr.msra.gmra.mxu0 %vm516_vm1, %v2084_v60 }
 0x1b8   : > { %v1449_v62 = vpop.f32.mrf.mxu0  ;;  %1360 = vmatpush3.msra.mxu1 %v1561_v2  ;;  %1395 = vmatpush3.msra.mxu0 %v1568_v3  ;;  %v2309_v2 = vld [vmem:[#allocation4_spill] sm:$0xff]  ;;  %v2310_v3 = vld [vmem:[#allocation5_spill] sm:$0xff] }
 0x1b9   : > { %1361 = vmatprep.subr.mxu1 %v1573_v4  ;;  %1396 = vmatprep.subr.mxu0 %v1578_v5  ;;  %v2311_v4 = vld [vmem:[#allocation6_spill] sm:$0xff]  ;;  %v2312_v5 = vld [vmem:[#allocation7_spill] sm:$0xff] }
 0x1ba   : > { %1362 = vmatpush3.msra.mxu1 %v1585_v6  ;;  %1397 = vmatpush3.msra.mxu0 %v1590_v7  ;;  %v2313_v6 = vld [vmem:[#allocation8_spill] sm:$0xff]  ;;  %v2314_v7 = vld [vmem:[#allocation9_spill] sm:$0xff] }
 0x1bb   : > { %1363 = vmatprep.subr.mxu1 %v1595_v8  ;;  %1398 = vmatprep.subr.mxu0 %v1602_v9  ;;  %v2315_v8 = vld [vmem:[#allocation10_spill] sm:$0xff]  ;;  %v2316_v9 = vld [vmem:[#allocation12_spill] sm:$0xff] }
 0x1bc   : > { %1364 = vmatpush3.msra.mxu1 %v1607_v10  ;;  %1399 = vmatpush3.msra.mxu0 %v1612_v11 }
 0x1bd   : > { %1365 = vmatprep.subr.mxu1 %v1619_v12  ;;  %1400 = vmatprep.subr.mxu0 %v1624_v13  ;;  %v2317_v12 = vld [vmem:[#allocation14_spill] sm:$0xff] }
 0x1be   : > { %1366 = vmatpush3.msra.mxu1 %v1631_v14  ;;  %1401 = vmatpush3.msra.mxu0 %v1636_v15  ;;  %v2318_v14 = vld [vmem:[#allocation15_spill] sm:$0xff] }
 0x1bf   : > { %1367 = vmatprep.subr.mxu1 %v1643_v16  ;;  %1402 = vmatprep.subr.mxu0 %v1648_v17 }
 0x1c0   : > { %1368 = vmatpush3.msra.mxu1 %v1655_v18  ;;  %1403 = vmatpush3.msra.mxu0 %v1660_v19  ;;  %v2319_v18 = vld [vmem:[#allocation11_spill] sm:$0xff] }
 0x1c1   : > { %1369 = vmatprep.subr.mxu1 %v1667_v20  ;;  %1404 = vmatprep.subr.mxu0 %v1672_v21  ;;  %v2320_v20 = vld [vmem:[#allocation13_spill] sm:$0xff] }
 0x1c2   : > { %1370 = vmatpush3.msra.mxu1 %v1679_v22  ;;  %1405 = vmatpush3.msra.mxu0 %v1684_v23 }
 0x1c3   : > { %1371 = vmatprep.subr.mxu1 %v1691_v24  ;;  %1406 = vmatprep.subr.mxu0 %v1696_v25 }
 0x1c4   : > { %1372 = vmatpush3.msra.mxu1 %v1703_v26  ;;  %1407 = vmatpush3.msra.mxu0 %v1708_v27  ;;  %v370_v26 = vld [vmem:[%s2251_s4 + $0x18] sm:$0xff]  ;;  %v369_v27 = vld [vmem:[%s2251_s4 + $0x10] sm:$0xff] }
 0x1c5   : > { %1373 = vmatprep.subr.mxu1 %v1715_v28  ;;  %1408 = vmatprep.subr.mxu0 %v1720_v29  ;;  %v368_v28 = vld [vmem:[%s2251_s4 + $0x8] sm:$0xff]  ;;  %v367_v29 = vld [vmem:[%s2251_s4] sm:$0xff] }
 0x1c6   : > { %1374 = vmatpush3.msra.mxu1 %v1727_v30  ;;  %1409 = vmatpush3.msra.mxu0 %v1732_v31  ;;  %v2321_v30 = vld [vmem:[#allocation16_spill] sm:$0xff] }
 0x1c7   : > { %1375 = vmatprep.subr.mxu1 %v1739_v32  ;;  %1410 = vmatprep.subr.mxu0 %v1744_v33 }
 0x1c8   : > { %1376 = vmatpush3.msra.mxu1 %v1751_v34  ;;  %1411 = vmatpush3.msra.mxu0 %v1756_v35 }
 0x1c9   : > { %1377 = vmatprep.subr.mxu1 %v1769_v36  ;;  %1412 = vmatprep.subr.mxu0 %v1774_v37 }
 0x1ca   : > { %1378 = vmatpush3.msra.mxu1 %v1781_v38  ;;  %1413 = vmatpush3.msra.mxu0 %v1786_v39 }
 0x1cb   : > { %1379 = vmatprep.subr.mxu1 %v1793_v40  ;;  %1414 = vmatprep.subr.mxu0 %v1798_v41 }
 0x1cc   : > { %1380 = vmatpush3.msra.mxu1 %v1805_v42  ;;  %1415 = vmatpush3.msra.mxu0 %v1810_v43 }
 0x1cd   : > { %1381 = vmatprep.subr.mxu1 %v1823_v44  ;;  %1416 = vmatprep.subr.mxu0 %v1828_v45  ;;  %v2322_v44 = vld [vmem:[#allocation18_spill] sm:$0xff]  ;;  %v2323_v45 = vld [vmem:[#allocation19_spill] sm:$0xff] }
 0x1ce   : > { %1382 = vmatpush3.msra.mxu1 %v1835_v46  ;;  %1417 = vmatpush3.msra.mxu0 %v1840_v47  ;;  %v2324_v46 = vld [vmem:[#allocation20_spill] sm:$0xff]  ;;  %v2325_v47 = vld [vmem:[#allocation21_spill] sm:$0xff] }
 0x1cf   : > { %1383 = vmatprep.subr.mxu1 %v1847_v48  ;;  %1418 = vmatprep.subr.mxu0 %v1852_v49  ;;  %v2326_v48 = vld [vmem:[#allocation22_spill] sm:$0xff]  ;;  %v374_v49 = vld [vmem:[%s2252_s5 + $0x18] sm:$0xff] }
 0x1d0   : > { %1384 = vmatpush3.msra.mxu1 %v1859_v50  ;;  %1419 = vmatpush3.msra.mxu0 %v1864_v51  ;;  %v373_v50 = vld [vmem:[%s2252_s5 + $0x10] sm:$0xff]  ;;  %v372_v51 = vld [vmem:[%s2252_s5 + $0x8] sm:$0xff] }
 0x1d1   : > { %1385 = vmatprep.subr.mxu1 %v1872_v52  ;;  %1420 = vmatprep.subr.mxu0 %v1877_v53  ;;  %v371_v52 = vld [vmem:[%s2252_s5] sm:$0xff]  ;;  %v2327_v53 = vld [vmem:[#allocation17_spill] sm:$0xff] }
 0x1d2   : > { %1386 = vmatpush3.msra.mxu1 %v2307_v0  ;;  %1421 = vmatpush3.msra.mxu0 %v2308_v1  ;;  %v966_v0 = vsub.f32 %v2029_v58, %v2084_v60  ;;  %v1275_v58 = vld [vmem:[%s2253_s6] ss:$0 sm:$0xff] }
 0x1d3   : > { %1387 = vmatprep.subr.mxu1 %v2309_v2  ;;  %1422 = vmatprep.subr.mxu0 %v2310_v3  ;;  %v2328_v3 = vld [vmem:[#allocation23_spill] sm:$0xff] }
 0x1d4   : > { %1388 = vmatpush3.msra.mxu1 %v2311_v4  ;;  %1423 = vmatpush3.msra.mxu0 %v2312_v5  ;;  %v2329_v4 = vld [vmem:[#allocation24_spill] sm:$0xff]  ;;  %v2330_v5 = vld [vmem:[#allocation25_spill] sm:$0xff] }
 0x1d5   : > { %1389 = vmatprep.subr.mxu1 %v2313_v6  ;;  %1424 = vmatprep.subr.mxu0 %v2314_v7 }
 0x1d6   : > { %1390 = vmatpush3.msra.mxu1 %v2315_v8  ;;  %1425 = vmatpush3.msra.mxu0 %v2316_v9 }
 0x1d7   : > { %1450 = vmatprep.subr.mxu1 %v2304_v59  ;;  %1461 = vmatprep.subr.mxu0 %v2304_v59 }
 0x277   : > { %v659_v10 = vpop.f32.mrf.mxu1  ;;  %v730_v11 = vpop.f32.mrf.mxu0 }
 0x278   : > { %v2155_v13 = vsub.f32 %v2317_v12, %v659_v10  ;;  %v2158_v15 = vsub.f32 %v2318_v14, %v730_v11 }
 0x279   : > { %v661_v16 = vpop.f32.mrf.mxu1  ;;  %v732_v17 = vpop.f32.mrf.mxu0 }
 0x27a   : > { %v2161_v19 = vsub.f32 %v2319_v18, %v661_v16  ;;  %v2164_v21 = vsub.f32 %v2320_v20, %v732_v17  ;;  %v739_v24 = vmul.f32 %v2155_v13, %v2155_v13  ;;  %v741_v25 = vmul.f32 %v2158_v15, %v2158_v15 }
 0x27c   : > { %v740_v22 = vmul.f32 %v2161_v19, %v2161_v19  ;;  %v742_v23 = vmul.f32 %v2164_v21, %v2164_v21 }
 0x27e   : > { %807 = vmatprep.mubr.f32.mxu1 %v740_v22  ;;  %877 = vmatprep.mubr.f32.mxu0 %v742_v23 }
 0x27f   : > { %808 = vmatmul.mubr.f32.vlgmr.msra.gmra.mxu1 %v739_v24  ;;  %878 = vmatmul.mubr.f32.vlgmr.msra.gmra.mxu0 %v741_v25 }
 0x280   : > { %1458 = vmatprep.mubr.msk.f32.mxu1 %vm1499_vm0, %v2304_v59  ;;  %1469 = vmatprep.mubr.msk.f32.mxu0 %vm1499_vm0, %v2304_v59 }
 0x281   : > { %1451 = vmatpush3.msra.mxu1 %v370_v26  ;;  %1462 = vmatpush3.msra.mxu0 %v374_v49 }
 0x282   : > { %1452 = vmatprep.subr.mxu1 %v2304_v59  ;;  %1463 = vmatprep.subr.mxu0 %v2304_v59 }
 0x283   : > { %1453 = vmatpush3.msra.mxu1 %v369_v27  ;;  %1464 = vmatpush3.msra.mxu0 %v373_v50 }
 0x284   : > { %1454 = vmatprep.subr.mxu1 %v2304_v59  ;;  %1465 = vmatprep.subr.mxu0 %v2304_v59 }
 0x285   : > { %1455 = vmatpush3.msra.mxu1 %v368_v28  ;;  %1466 = vmatpush3.msra.mxu0 %v372_v51 }
 0x286   : > { %1456 = vmatprep.subr.mxu1 %v2304_v59  ;;  %1467 = vmatprep.subr.mxu0 %v2304_v59 }
 0x287   : > { %1457 = vmatpush3.msra.mxu1 %v367_v29  ;;  %1468 = vmatpush3.msra.mxu0 %v371_v52 }
 0x288   : > { %1081 = vmatprep.subr.mxu1 %v2321_v30  ;;  %1152 = vmatprep.subr.mxu0 %v2327_v53 }
 0x33f   : > { %v1391_v31 = vpop.f32.mrf.mxu1  ;;  %v1426_v32 = vpop.f32.mrf.mxu0 }
 0x341   : > { %v1392_v33 = vpop.f32.mrf.mxu1  ;;  %v1427_v34 = vpop.f32.mrf.mxu0 }
 0x342   : > { %v1393_v35 = vadd.f32 %v1392_v33, %v1391_v31  ;;  %v1428_v37 = vadd.f32 %v1427_v34, %v1426_v32 }
 0x344   : > { %v810_v36 = vadd.f32 1e-08, %v1393_v35 }
 0x346   : > { %v880_v38 = vadd.f32 %v1428_v37, %v810_v36 }
 0x348   : > { %1482 = vrsqrt.f32 %v880_v38  ;;  %vm885_vm2 = vcmp.eq.f32.partialorder %v880_v38, inf  ;;  %v888_v41 = vand.u32 2147483648, %v880_v38  ;;  %vm887_vm3 = vcmp.eq.f32.partialorder %v880_v38, 0.0 }
 0x355   : > { %v1483_v39 = vpop.eup %1482 }
 0x356   : > { %v884_v40 = vmul.f32 %v1483_v39, %v880_v38 }
 0x358   : > { %v886_v42 = vsel %vm885_vm2, %v880_v38, %v884_v40 }
 0x359   : > { %v889_v43 = vsel %vm887_vm3, %v888_v41, %v886_v42 }
 0x35a   : > { %1459 = vmatmul.mubr.msk.f32.vlgmr.msra.gmra.mxu1 %vm516_vm1, %v889_v43 }
 0x35b   : > { %1082 = vmatpush1.msra.mxu1 %v2322_v44  ;;  %1121 = vmatprep.mubr.f32.mxu1 %v2304_v59 }
 0x35c   : > { %1083 = vmatprep.subr.mxu1 %v2323_v45 }
 0x35d   : > { %1084 = vmatpush1.msra.mxu1 %v2324_v46 }
 0x35e   : > { %1085 = vmatprep.subr.mxu1 %v2325_v47 }
 0x35f   : > { %1086 = vmatpush1.msra.mxu1 %v2326_v48 }
 0x360   : > { %1087 = vmatprep.subr.mxu1 %v2025_v56 }
 0x361   : > { %1088 = vmatpush1.msra.mxu1 %v2073_v61 }
 0x41a   : > { %v959_v56 = vpop.f32.mrf.mxu1 }
 0x41b   : > { %vm963_vm4 = vcmp.le.f32.partialorder %v959_v56, 1e-08 }
 0x41c   : > { %v964_v62 = vsel %vm963_vm4, 1.0, %v959_v56  ;;  %v1460_v61 = vpop.f32.mrf.mxu1 }
 0x41d   : > { %1484 = vrcp.f32 %v964_v62 }
 0x42a   : > { %v1485_v1 = vpop.eup %1484 }
 0x42b   : > { %v967_v2 = vmul.f32 %v1485_v1, %v966_v0 }
 0x42d   : > { %1470 = vmatmul.mubr.msk.f32.vlgmr.msra.gmra.mxu0 %vm516_vm1, %v967_v2 }
 0x42e   : > { %1153 = vmatpush1.msra.mxu0 %v2034_v54  ;;  %1192 = vmatprep.mubr.f32.mxu0 %v2304_v59 }
 0x42f   : > { %1154 = vmatprep.subr.mxu0 %v2039_v63 }
 0x430   : > { %1155 = vmatpush1.msra.mxu0 %v2328_v3 }
 0x431   : > { %1156 = vmatprep.subr.mxu0 %v2052_v57 }
 0x432   : > { %1157 = vmatpush1.msra.mxu0 %v2329_v4 }
 0x433   : > { %1158 = vmatprep.subr.mxu0 %v2330_v5 }
 0x434   : > { %1159 = vmatpush1.msra.mxu0 %v2078_v55 }
 0x4ed   : > { %v1043_v54 = vpop.f32.mrf.mxu0 }
 0x4ee   : > { %v1044_v60 = vadd.f32 %v1275_v58, %v1043_v54 }
 0x4ef   : > { %v1471_v59 = vpop.f32.mrf.mxu0 }
 0x4f0   : > { %v1277_v6 = vmul.f32 -1.442695, %v1044_v60 }
 0x4f2   : > { %1486 = vpow2.f32 %v1277_v6 }
 0x4ff   : > { %v1487_v63 = vpop.eup %1486 }
 0x500   : > { %v1050_v7 = vadd.f32 1.0, %v1487_v63 }
 0x502   : > { %1488 = vrcp.f32 %v1050_v7 }
 0x50f   : > { %v1489_v57 = vpop.eup %1488 }
 0x510   : > { %v1053_v8 = vmul.f32 %v1489_v57, %v1485_v1 }
 0x512   : > { %1278 = vmatmul.mubr.msk.f32.vlgmr.msra.gmra.mxu1 %vm516_vm1, %v1053_v8  ;;  %1279 = vmatmul.mubr.msk.f32.vlgmr.msra.gmra.mxu0 %vm516_vm1, %v1053_v8 }
 0x5d2   : > { %v1123_v55 = vpop.f32.mrf.mxu1  ;;  %v1194_v9 = vpop.f32.mrf.mxu0 }
 0x5d3   : > { %v1199_v10 = vmul.f32 %v1123_v55, %v2155_v13  ;;  %v1201_v11 = vmul.f32 %v1194_v9, %v2158_v15 }
 0x5d4   : > { %v1125_v12 = vpop.f32.mrf.mxu1  ;;  %v1196_v14 = vpop.f32.mrf.mxu0 }
 0x5d5   : > { %1203 = vst [vmem:[%s278_s11] sm:$0xff] %v1199_v10  ;;  %1205 = vst [vmem:[%s278_s11 + $0x10] sm:$0xff] %v1201_v11  ;;  %v1200_v16 = vmul.f32 %v1125_v12, %v2161_v19  ;;  %v1202_v17 = vmul.f32 %v1196_v14, %v2164_v21 }
 0x5d7   : > { %1204 = vst [vmem:[%s278_s11 + $0x8] sm:$0xff] %v1200_v16  ;;  %1206 = vst [vmem:[%s278_s11 + $0x18] sm:$0xff] %v1202_v17 }
 0x5d8 PF: > { %s17_s24 = sadd.s32 1, %s1496_s24  }
 0x5d9   : > { %p14_p4 = scmp.ge.s32.totalorder %s17_s24, 6  }
 0x5db   :  { %16 = sbr.rel (!%p14_p4) target bundleno = 1 (0x1), region = 78 }

</bundles_post_ra>
